<compile_context>
chip_gen: v6e
topology: v6e:2x2x1
jax: 0.10.0
libtpu: 0.0.40
codegen_flags: <defaults>
</compile_context>

<pallas_src>
import functools

import numpy as np
import jax
import jax.numpy as jnp
from jax.experimental import pallas as pl
from jax.experimental.pallas import tpu as pltpu


def gru_kernel(x_ref,      # (T*B, I)  time-major flattened input (row = t*B + b)
               wih_ref,    # (I, 3H)   weight_ih_l0.T   (gate order: r, z, n)
               whh_ref,    # (H, 3H)   weight_hh_l0.T
               bx_ref,     # (1, 3H)   b_ih with b_hh pre-folded into the r/z columns
               bhn_ref,    # (1, H)    b_hh n-gate columns (must stay inside r*(...))
               w1_ref,     # (H, 4)    fc1 weight, transposed
               b1_ref,     # (1, 4)
               w2_ref,     # (4, 2)    fc2 weight, transposed
               b2_ref,     # (1, 2)
               out_ref,    # (B, 2)    softmax probabilities
               *, T, B):
    H = whh_ref.shape[0]

    # ---- input projection hoisted out of the recurrence: 1 MXU matmul for all T ----
    gx_all = jnp.dot(x_ref[...], wih_ref[...],
                     preferred_element_type=jnp.float32) + bx_ref[...]    # (T*B, 3H)

    whh = whh_ref[...]        # (H, 3H) held in vregs across the unrolled loop
    bhn = bhn_ref[...]        # (1, H)

    h = jnp.zeros((B, H), jnp.float32)
    # ---- fully unrolled recurrence (T is static) -> static slices, interleavable ----
    for t in range(T):
        gx = gx_all[t * B:(t + 1) * B, :]                                 # (B, 3H)

        # recurrent projection on the VPU: H=4 broadcast multiply-adds,
        # avoids the tiny (B,H)@(H,3H) MXU round-trip on the serial path.
        gh = h[:, 0:1] * whh[0:1, :]
        for k in range(1, H):
            gh = gh + h[:, k:k + 1] * whh[k:k + 1, :]                     # (B, 3H)

        # fused r/z sigmoid: one EUP region over 2H columns
        rz = jax.nn.sigmoid(gx[:, 0:2 * H] + gh[:, 0:2 * H])
        r = rz[:, 0:H]
        z = rz[:, H:2 * H]
        # PyTorch: n = tanh(W_in x + b_in + r * (W_hn h + b_hn))
        n = jnp.tanh(gx[:, 2 * H:3 * H] + r * (gh[:, 2 * H:3 * H] + bhn))
        h = (1.0 - z) * n + z * h

    # ---- MLP head: Linear(4,4) -> ReLU -> Linear(4,2) -> softmax (one-shot cost) ----
    y = jnp.dot(h, w1_ref[...], preferred_element_type=jnp.float32) + b1_ref[...]
    y = jnp.maximum(y, 0.0)
    y = jnp.dot(y, w2_ref[...], preferred_element_type=jnp.float32) + b2_ref[...]

    y = y - jnp.max(y, axis=1, keepdims=True)
    e = jnp.exp(y)
    # (B, 2) output is tiny; masked store is negligible at this size.
    out_ref[...] = e / jnp.sum(e, axis=1, keepdims=True)


def gru_model(x, params):
    """x: (B, T, I) float32 — same convention as the PyTorch module (batch_first)."""
    (w_ih, w_hh, b_ih, b_hh, fc1_w, fc1_b, fc2_w, fc2_b) = params
    B, T, I = x.shape
    H = w_hh.shape[1]

    # time-major then flatten so row index = t*B + b (static per-step slices in-kernel)
    x_2d = jnp.transpose(x, (1, 0, 2)).reshape(T * B, I)

    # fold b_hh into the r/z bias columns (those gates are sigmoid(gx + gh) with both
    # biases added unconditionally); keep the n-gate b_hh separate — PyTorch applies it
    # inside r * (h @ W_hn + b_hn).
    bias_x = jnp.concatenate([b_ih[:2 * H] + b_hh[:2 * H], b_ih[2 * H:]]).reshape(1, 3 * H)
    bias_hn = b_hh[2 * H:3 * H].reshape(1, H)

    args = (
        x_2d,
        jnp.transpose(w_ih),       # (I, 3H)
        jnp.transpose(w_hh),       # (H, 3H)
        bias_x,                    # (1, 3H)
        bias_hn,                   # (1, H)
        jnp.transpose(fc1_w),      # (H, 4)
        fc1_b.reshape(1, -1),      # (1, 4)
        jnp.transpose(fc2_w),      # (4, 2)
        fc2_b.reshape(1, -1),      # (1, 2)
    )

    vmem = pl.BlockSpec(memory_space=pltpu.MemorySpace.VMEM)
    kernel = functools.partial(gru_kernel, T=T, B=B)
    # No grid: the whole working set is <1 KiB, so a single grid-less invocation with
    # everything resident in VMEM is the right structure. (If B grows, add a parallel
    # batch grid axis so v7x's two TensorCores split the batch.)
    return pl.pallas_call(
        kernel,
        out_shape=jax.ShapeDtypeStruct((B, 2), jnp.float32),
        in_specs=[vmem] * len(args),
        out_specs=vmem,
    )(*args)


def reference(x, params):
    """Pure-JAX replica of the PyTorch forward (for correctness check)."""
    (w_ih, w_hh, b_ih, b_hh, fc1_w, fc1_b, fc2_w, fc2_b) = params
    B, T, I = x.shape
    H = w_hh.shape[1]
    h = jnp.zeros((B, H), jnp.float32)
    for t in range(T):
        x_t = x[:, t, :]
        gx = x_t @ w_ih.T + b_ih
        gh = h @ w_hh.T + b_hh
        r = jax.nn.sigmoid(gx[:, 0:H] + gh[:, 0:H])
        z = jax.nn.sigmoid(gx[:, H:2 * H] + gh[:, H:2 * H])
        n = jnp.tanh(gx[:, 2 * H:] + r * gh[:, 2 * H:])
        h = (1.0 - z) * n + z * h
    y = jnp.maximum(h @ fc1_w.T + fc1_b, 0.0)
    y = y @ fc2_w.T + fc2_b
    return jax.nn.softmax(y, axis=1)


if __name__ == "__main__":
    I = 4       # input_size
    H = 4       # hidden_size
    B = 2       # batch
    T = 8       # sequence length

    key = jax.random.PRNGKey(0)
    ks = jax.random.split(key, 10)
    bound = 1.0 / np.sqrt(H)

    # PyTorch-shaped parameters (gate order r, z, n), deterministic init.
    w_ih  = jax.random.uniform(ks[0], (3 * H, I), jnp.float32, -bound, bound)
    w_hh  = jax.random.uniform(ks[1], (3 * H, H), jnp.float32, -bound, bound)
    b_ih  = jax.random.uniform(ks[2], (3 * H,),   jnp.float32, -bound, bound)
    b_hh  = jax.random.uniform(ks[3], (3 * H,),   jnp.float32, -bound, bound)
    fc1_w = jax.random.uniform(ks[4], (4, H),     jnp.float32, -0.5, 0.5)
    fc1_b = jax.random.uniform(ks[5], (4,),       jnp.float32, -0.5, 0.5)
    fc2_w = jax.random.uniform(ks[6], (2, 4),     jnp.float32, -0.5, 0.5)
    fc2_b = jax.random.uniform(ks[7], (2,),       jnp.float32, -0.5, 0.5)
    params = (w_ih, w_hh, b_ih, b_hh, fc1_w, fc1_b, fc2_w, fc2_b)

    x = jax.random.normal(ks[8], (B, T, I), jnp.float32)

    out = gru_model(x, params)
    out = jax.block_until_ready(out)

    ref = reference(x, params)
    np.testing.assert_allclose(np.asarray(out), np.asarray(ref), rtol=1e-5, atol=1e-5)

    print("KERNEL_OK")
</pallas_src>

<mosaic_0001>
module attributes {stable_mosaic.version = 11 : i64} {
  func.func @gru_kernel(%arg0: memref<16x4xf32, #tpu.memory_space<vmem>>, %arg1: memref<4x12xf32, #tpu.memory_space<vmem>>, %arg2: memref<4x12xf32, #tpu.memory_space<vmem>>, %arg3: memref<1x12xf32, #tpu.memory_space<vmem>>, %arg4: memref<1x4xf32, #tpu.memory_space<vmem>>, %arg5: memref<4x4xf32, #tpu.memory_space<vmem>>, %arg6: memref<1x4xf32, #tpu.memory_space<vmem>>, %arg7: memref<4x2xf32, #tpu.memory_space<vmem>>, %arg8: memref<1x2xf32, #tpu.memory_space<vmem>>, %arg9: memref<2x2xf32, #tpu.memory_space<vmem>>) attributes {dimension_semantics = [], scalar_prefetch = 0 : i64, scratch_operands = 0 : i64, tpu.core_type = #tpu.core_type<tc>} {
    %c0 = arith.constant 0 : index
    %c0_0 = arith.constant 0 : index
    %0 = vector.load %arg0[%c0, %c0_0] : memref<16x4xf32, #tpu.memory_space<vmem>>, vector<16x4xf32>
    %c0_1 = arith.constant 0 : index
    %c0_2 = arith.constant 0 : index
    %1 = vector.load %arg1[%c0_1, %c0_2] : memref<4x12xf32, #tpu.memory_space<vmem>>, vector<4x12xf32>
    %cst = arith.constant dense<0.000000e+00> : vector<16x12xf32>
    %2 = tpu.matmul %0, %1, %cst {dimension_numbers = #tpu.dot_dimension_numbers<[1], [0], [0], [1], [0, 0, 1, 1], [], []>} : vector<16x4xf32>, vector<4x12xf32>, vector<16x12xf32> -> vector<16x12xf32>
    %c0_3 = arith.constant 0 : index
    %c0_4 = arith.constant 0 : index
    %3 = vector.load %arg3[%c0_3, %c0_4] : memref<1x12xf32, #tpu.memory_space<vmem>>, vector<1x12xf32>
    %4 = vector.broadcast %3 : vector<1x12xf32> to vector<16x12xf32>
    %5 = arith.addf %2, %4 : vector<16x12xf32>
    %c0_5 = arith.constant 0 : index
    %c0_6 = arith.constant 0 : index
    %6 = vector.load %arg2[%c0_5, %c0_6] : memref<4x12xf32, #tpu.memory_space<vmem>>, vector<4x12xf32>
    %c0_7 = arith.constant 0 : index
    %c0_8 = arith.constant 0 : index
    %7 = vector.load %arg4[%c0_7, %c0_8] : memref<1x4xf32, #tpu.memory_space<vmem>>, vector<1x4xf32>
    %cst_9 = arith.constant 0.000000e+00 : f32
    %8 = vector.broadcast %cst_9 : f32 to vector<2x4xf32>
    %9 = vector.extract_strided_slice %5 {offsets = [0, 0], sizes = [2, 12], strides = [1, 1]} : vector<16x12xf32> to vector<2x12xf32>
    %10 = vector.extract_strided_slice %8 {offsets = [0, 0], sizes = [2, 1], strides = [1, 1]} : vector<2x4xf32> to vector<2x1xf32>
    %11 = vector.extract_strided_slice %6 {offsets = [0, 0], sizes = [1, 12], strides = [1, 1]} : vector<4x12xf32> to vector<1x12xf32>
    %12 = vector.broadcast %10 : vector<2x1xf32> to vector<2x12xf32>
    %13 = vector.broadcast %11 : vector<1x12xf32> to vector<2x12xf32>
    %14 = arith.mulf %12, %13 : vector<2x12xf32>
    %15 = vector.extract_strided_slice %8 {offsets = [0, 1], sizes = [2, 1], strides = [1, 1]} : vector<2x4xf32> to vector<2x1xf32>
    %16 = vector.extract_strided_slice %6 {offsets = [1, 0], sizes = [1, 12], strides = [1, 1]} : vector<4x12xf32> to vector<1x12xf32>
    %17 = vector.broadcast %15 : vector<2x1xf32> to vector<2x12xf32>
    %18 = vector.broadcast %16 : vector<1x12xf32> to vector<2x12xf32>
    %19 = arith.mulf %17, %18 : vector<2x12xf32>
    %20 = arith.addf %14, %19 : vector<2x12xf32>
    %21 = vector.extract_strided_slice %8 {offsets = [0, 2], sizes = [2, 1], strides = [1, 1]} : vector<2x4xf32> to vector<2x1xf32>
    %22 = vector.extract_strided_slice %6 {offsets = [2, 0], sizes = [1, 12], strides = [1, 1]} : vector<4x12xf32> to vector<1x12xf32>
    %23 = vector.broadcast %21 : vector<2x1xf32> to vector<2x12xf32>
    %24 = vector.broadcast %22 : vector<1x12xf32> to vector<2x12xf32>
    %25 = arith.mulf %23, %24 : vector<2x12xf32>
    %26 = arith.addf %20, %25 : vector<2x12xf32>
    %27 = vector.extract_strided_slice %8 {offsets = [0, 3], sizes = [2, 1], strides = [1, 1]} : vector<2x4xf32> to vector<2x1xf32>
    %28 = vector.extract_strided_slice %6 {offsets = [3, 0], sizes = [1, 12], strides = [1, 1]} : vector<4x12xf32> to vector<1x12xf32>
    %29 = vector.broadcast %27 : vector<2x1xf32> to vector<2x12xf32>
    %30 = vector.broadcast %28 : vector<1x12xf32> to vector<2x12xf32>
    %31 = arith.mulf %29, %30 : vector<2x12xf32>
    %32 = arith.addf %26, %31 : vector<2x12xf32>
    %33 = vector.extract_strided_slice %9 {offsets = [0, 0], sizes = [2, 8], strides = [1, 1]} : vector<2x12xf32> to vector<2x8xf32>
    %34 = vector.extract_strided_slice %32 {offsets = [0, 0], sizes = [2, 8], strides = [1, 1]} : vector<2x12xf32> to vector<2x8xf32>
    %35 = arith.addf %33, %34 : vector<2x8xf32>
    %36 = arith.negf %35 : vector<2x8xf32>
    %37 = math.exp %36 : vector<2x8xf32>
    %cst_10 = arith.constant 1.000000e+00 : f32
    %38 = vector.broadcast %cst_10 : f32 to vector<2x8xf32>
    %39 = arith.addf %38, %37 : vector<2x8xf32>
    %40 = arith.divf %38, %39 : vector<2x8xf32>
    %41 = vector.extract_strided_slice %40 {offsets = [0, 0], sizes = [2, 4], strides = [1, 1]} : vector<2x8xf32> to vector<2x4xf32>
    %42 = vector.extract_strided_slice %40 {offsets = [0, 4], sizes = [2, 4], strides = [1, 1]} : vector<2x8xf32> to vector<2x4xf32>
    %43 = vector.extract_strided_slice %9 {offsets = [0, 8], sizes = [2, 4], strides = [1, 1]} : vector<2x12xf32> to vector<2x4xf32>
    %44 = vector.extract_strided_slice %32 {offsets = [0, 8], sizes = [2, 4], strides = [1, 1]} : vector<2x12xf32> to vector<2x4xf32>
    %45 = vector.broadcast %7 : vector<1x4xf32> to vector<2x4xf32>
    %46 = arith.addf %44, %45 : vector<2x4xf32>
    %47 = arith.mulf %41, %46 : vector<2x4xf32>
    %48 = arith.addf %43, %47 : vector<2x4xf32>
    %49 = math.tanh %48 : vector<2x4xf32>
    %cst_11 = arith.constant 1.000000e+00 : f32
    %50 = vector.broadcast %cst_11 : f32 to vector<2x4xf32>
    %51 = arith.subf %50, %42 : vector<2x4xf32>
    %52 = arith.mulf %51, %49 : vector<2x4xf32>
    %53 = arith.mulf %42, %8 : vector<2x4xf32>
    %54 = arith.addf %52, %53 : vector<2x4xf32>
    %55 = vector.extract_strided_slice %5 {offsets = [2, 0], sizes = [2, 12], strides = [1, 1]} : vector<16x12xf32> to vector<2x12xf32>
    %56 = vector.extract_strided_slice %54 {offsets = [0, 0], sizes = [2, 1], strides = [1, 1]} : vector<2x4xf32> to vector<2x1xf32>
    %57 = vector.extract_strided_slice %6 {offsets = [0, 0], sizes = [1, 12], strides = [1, 1]} : vector<4x12xf32> to vector<1x12xf32>
    %58 = vector.broadcast %56 : vector<2x1xf32> to vector<2x12xf32>
    %59 = vector.broadcast %57 : vector<1x12xf32> to vector<2x12xf32>
    %60 = arith.mulf %58, %59 : vector<2x12xf32>
    %61 = vector.extract_strided_slice %54 {offsets = [0, 1], sizes = [2, 1], strides = [1, 1]} : vector<2x4xf32> to vector<2x1xf32>
    %62 = vector.extract_strided_slice %6 {offsets = [1, 0], sizes = [1, 12], strides = [1, 1]} : vector<4x12xf32> to vector<1x12xf32>
    %63 = vector.broadcast %61 : vector<2x1xf32> to vector<2x12xf32>
    %64 = vector.broadcast %62 : vector<1x12xf32> to vector<2x12xf32>
    %65 = arith.mulf %63, %64 : vector<2x12xf32>
    %66 = arith.addf %60, %65 : vector<2x12xf32>
    %67 = vector.extract_strided_slice %54 {offsets = [0, 2], sizes = [2, 1], strides = [1, 1]} : vector<2x4xf32> to vector<2x1xf32>
    %68 = vector.extract_strided_slice %6 {offsets = [2, 0], sizes = [1, 12], strides = [1, 1]} : vector<4x12xf32> to vector<1x12xf32>
    %69 = vector.broadcast %67 : vector<2x1xf32> to vector<2x12xf32>
    %70 = vector.broadcast %68 : vector<1x12xf32> to vector<2x12xf32>
    %71 = arith.mulf %69, %70 : vector<2x12xf32>
    %72 = arith.addf %66, %71 : vector<2x12xf32>
    %73 = vector.extract_strided_slice %54 {offsets = [0, 3], sizes = [2, 1], strides = [1, 1]} : vector<2x4xf32> to vector<2x1xf32>
    %74 = vector.extract_strided_slice %6 {offsets = [3, 0], sizes = [1, 12], strides = [1, 1]} : vector<4x12xf32> to vector<1x12xf32>
    %75 = vector.broadcast %73 : vector<2x1xf32> to vector<2x12xf32>
    %76 = vector.broadcast %74 : vector<1x12xf32> to vector<2x12xf32>
    %77 = arith.mulf %75, %76 : vector<2x12xf32>
    %78 = arith.addf %72, %77 : vector<2x12xf32>
    %79 = vector.extract_strided_slice %55 {offsets = [0, 0], sizes = [2, 8], strides = [1, 1]} : vector<2x12xf32> to vector<2x8xf32>
    %80 = vector.extract_strided_slice %78 {offsets = [0, 0], sizes = [2, 8], strides = [1, 1]} : vector<2x12xf32> to vector<2x8xf32>
    %81 = arith.addf %79, %80 : vector<2x8xf32>
    %82 = arith.negf %81 : vector<2x8xf32>
    %83 = math.exp %82 : vector<2x8xf32>
    %cst_12 = arith.constant 1.000000e+00 : f32
    %84 = vector.broadcast %cst_12 : f32 to vector<2x8xf32>
    %85 = arith.addf %84, %83 : vector<2x8xf32>
    %86 = arith.divf %84, %85 : vector<2x8xf32>
    %87 = vector.extract_strided_slice %86 {offsets = [0, 0], sizes = [2, 4], strides = [1, 1]} : vector<2x8xf32> to vector<2x4xf32>
    %88 = vector.extract_strided_slice %86 {offsets = [0, 4], sizes = [2, 4], strides = [1, 1]} : vector<2x8xf32> to vector<2x4xf32>
    %89 = vector.extract_strided_slice %55 {offsets = [0, 8], sizes = [2, 4], strides = [1, 1]} : vector<2x12xf32> to vector<2x4xf32>
    %90 = vector.extract_strided_slice %78 {offsets = [0, 8], sizes = [2, 4], strides = [1, 1]} : vector<2x12xf32> to vector<2x4xf32>
    %91 = vector.broadcast %7 : vector<1x4xf32> to vector<2x4xf32>
    %92 = arith.addf %90, %91 : vector<2x4xf32>
    %93 = arith.mulf %87, %92 : vector<2x4xf32>
    %94 = arith.addf %89, %93 : vector<2x4xf32>
    %95 = math.tanh %94 : vector<2x4xf32>
    %cst_13 = arith.constant 1.000000e+00 : f32
    %96 = vector.broadcast %cst_13 : f32 to vector<2x4xf32>
    %97 = arith.subf %96, %88 : vector<2x4xf32>
    %98 = arith.mulf %97, %95 : vector<2x4xf32>
    %99 = arith.mulf %88, %54 : vector<2x4xf32>
    %100 = arith.addf %98, %99 : vector<2x4xf32>
    %101 = vector.extract_strided_slice %5 {offsets = [4, 0], sizes = [2, 12], strides = [1, 1]} : vector<16x12xf32> to vector<2x12xf32>
    %102 = vector.extract_strided_slice %100 {offsets = [0, 0], sizes = [2, 1], strides = [1, 1]} : vector<2x4xf32> to vector<2x1xf32>
    %103 = vector.extract_strided_slice %6 {offsets = [0, 0], sizes = [1, 12], strides = [1, 1]} : vector<4x12xf32> to vector<1x12xf32>
    %104 = vector.broadcast %102 : vector<2x1xf32> to vector<2x12xf32>
    %105 = vector.broadcast %103 : vector<1x12xf32> to vector<2x12xf32>
    %106 = arith.mulf %104, %105 : vector<2x12xf32>
    %107 = vector.extract_strided_slice %100 {offsets = [0, 1], sizes = [2, 1], strides = [1, 1]} : vector<2x4xf32> to vector<2x1xf32>
    %108 = vector.extract_strided_slice %6 {offsets = [1, 0], sizes = [1, 12], strides = [1, 1]} : vector<4x12xf32> to vector<1x12xf32>
    %109 = vector.broadcast %107 : vector<2x1xf32> to vector<2x12xf32>
    %110 = vector.broadcast %108 : vector<1x12xf32> to vector<2x12xf32>
    %111 = arith.mulf %109, %110 : vector<2x12xf32>
    %112 = arith.addf %106, %111 : vector<2x12xf32>
    %113 = vector.extract_strided_slice %100 {offsets = [0, 2], sizes = [2, 1], strides = [1, 1]} : vector<2x4xf32> to vector<2x1xf32>
    %114 = vector.extract_strided_slice %6 {offsets = [2, 0], sizes = [1, 12], strides = [1, 1]} : vector<4x12xf32> to vector<1x12xf32>
    %115 = vector.broadcast %113 : vector<2x1xf32> to vector<2x12xf32>
    %116 = vector.broadcast %114 : vector<1x12xf32> to vector<2x12xf32>
    %117 = arith.mulf %115, %116 : vector<2x12xf32>
    %118 = arith.addf %112, %117 : vector<2x12xf32>
    %119 = vector.extract_strided_slice %100 {offsets = [0, 3], sizes = [2, 1], strides = [1, 1]} : vector<2x4xf32> to vector<2x1xf32>
    %120 = vector.extract_strided_slice %6 {offsets = [3, 0], sizes = [1, 12], strides = [1, 1]} : vector<4x12xf32> to vector<1x12xf32>
    %121 = vector.broadcast %119 : vector<2x1xf32> to vector<2x12xf32>
    %122 = vector.broadcast %120 : vector<1x12xf32> to vector<2x12xf32>
    %123 = arith.mulf %121, %122 : vector<2x12xf32>
    %124 = arith.addf %118, %123 : vector<2x12xf32>
    %125 = vector.extract_strided_slice %101 {offsets = [0, 0], sizes = [2, 8], strides = [1, 1]} : vector<2x12xf32> to vector<2x8xf32>
    %126 = vector.extract_strided_slice %124 {offsets = [0, 0], sizes = [2, 8], strides = [1, 1]} : vector<2x12xf32> to vector<2x8xf32>
    %127 = arith.addf %125, %126 : vector<2x8xf32>
    %128 = arith.negf %127 : vector<2x8xf32>
    %129 = math.exp %128 : vector<2x8xf32>
    %cst_14 = arith.constant 1.000000e+00 : f32
    %130 = vector.broadcast %cst_14 : f32 to vector<2x8xf32>
    %131 = arith.addf %130, %129 : vector<2x8xf32>
    %132 = arith.divf %130, %131 : vector<2x8xf32>
    %133 = vector.extract_strided_slice %132 {offsets = [0, 0], sizes = [2, 4], strides = [1, 1]} : vector<2x8xf32> to vector<2x4xf32>
    %134 = vector.extract_strided_slice %132 {offsets = [0, 4], sizes = [2, 4], strides = [1, 1]} : vector<2x8xf32> to vector<2x4xf32>
    %135 = vector.extract_strided_slice %101 {offsets = [0, 8], sizes = [2, 4], strides = [1, 1]} : vector<2x12xf32> to vector<2x4xf32>
    %136 = vector.extract_strided_slice %124 {offsets = [0, 8], sizes = [2, 4], strides = [1, 1]} : vector<2x12xf32> to vector<2x4xf32>
    %137 = vector.broadcast %7 : vector<1x4xf32> to vector<2x4xf32>
    %138 = arith.addf %136, %137 : vector<2x4xf32>
    %139 = arith.mulf %133, %138 : vector<2x4xf32>
    %140 = arith.addf %135, %139 : vector<2x4xf32>
    %141 = math.tanh %140 : vector<2x4xf32>
    %cst_15 = arith.constant 1.000000e+00 : f32
    %142 = vector.broadcast %cst_15 : f32 to vector<2x4xf32>
    %143 = arith.subf %142, %134 : vector<2x4xf32>
    %144 = arith.mulf %143, %141 : vector<2x4xf32>
    %145 = arith.mulf %134, %100 : vector<2x4xf32>
    %146 = arith.addf %144, %145 : vector<2x4xf32>
    %147 = vector.extract_strided_slice %5 {offsets = [6, 0], sizes = [2, 12], strides = [1, 1]} : vector<16x12xf32> to vector<2x12xf32>
    %148 = vector.extract_strided_slice %146 {offsets = [0, 0], sizes = [2, 1], strides = [1, 1]} : vector<2x4xf32> to vector<2x1xf32>
    %149 = vector.extract_strided_slice %6 {offsets = [0, 0], sizes = [1, 12], strides = [1, 1]} : vector<4x12xf32> to vector<1x12xf32>
    %150 = vector.broadcast %148 : vector<2x1xf32> to vector<2x12xf32>
    %151 = vector.broadcast %149 : vector<1x12xf32> to vector<2x12xf32>
    %152 = arith.mulf %150, %151 : vector<2x12xf32>
    %153 = vector.extract_strided_slice %146 {offsets = [0, 1], sizes = [2, 1], strides = [1, 1]} : vector<2x4xf32> to vector<2x1xf32>
    %154 = vector.extract_strided_slice %6 {offsets = [1, 0], sizes = [1, 12], strides = [1, 1]} : vector<4x12xf32> to vector<1x12xf32>
    %155 = vector.broadcast %153 : vector<2x1xf32> to vector<2x12xf32>
    %156 = vector.broadcast %154 : vector<1x12xf32> to vector<2x12xf32>
    %157 = arith.mulf %155, %156 : vector<2x12xf32>
    %158 = arith.addf %152, %157 : vector<2x12xf32>
    %159 = vector.extract_strided_slice %146 {offsets = [0, 2], sizes = [2, 1], strides = [1, 1]} : vector<2x4xf32> to vector<2x1xf32>
    %160 = vector.extract_strided_slice %6 {offsets = [2, 0], sizes = [1, 12], strides = [1, 1]} : vector<4x12xf32> to vector<1x12xf32>
    %161 = vector.broadcast %159 : vector<2x1xf32> to vector<2x12xf32>
    %162 = vector.broadcast %160 : vector<1x12xf32> to vector<2x12xf32>
    %163 = arith.mulf %161, %162 : vector<2x12xf32>
    %164 = arith.addf %158, %163 : vector<2x12xf32>
    %165 = vector.extract_strided_slice %146 {offsets = [0, 3], sizes = [2, 1], strides = [1, 1]} : vector<2x4xf32> to vector<2x1xf32>
    %166 = vector.extract_strided_slice %6 {offsets = [3, 0], sizes = [1, 12], strides = [1, 1]} : vector<4x12xf32> to vector<1x12xf32>
    %167 = vector.broadcast %165 : vector<2x1xf32> to vector<2x12xf32>
    %168 = vector.broadcast %166 : vector<1x12xf32> to vector<2x12xf32>
    %169 = arith.mulf %167, %168 : vector<2x12xf32>
    %170 = arith.addf %164, %169 : vector<2x12xf32>
    %171 = vector.extract_strided_slice %147 {offsets = [0, 0], sizes = [2, 8], strides = [1, 1]} : vector<2x12xf32> to vector<2x8xf32>
    %172 = vector.extract_strided_slice %170 {offsets = [0, 0], sizes = [2, 8], strides = [1, 1]} : vector<2x12xf32> to vector<2x8xf32>
    %173 = arith.addf %171, %172 : vector<2x8xf32>
    %174 = arith.negf %173 : vector<2x8xf32>
    %175 = math.exp %174 : vector<2x8xf32>
    %cst_16 = arith.constant 1.000000e+00 : f32
    %176 = vector.broadcast %cst_16 : f32 to vector<2x8xf32>
    %177 = arith.addf %176, %175 : vector<2x8xf32>
    %178 = arith.divf %176, %177 : vector<2x8xf32>
    %179 = vector.extract_strided_slice %178 {offsets = [0, 0], sizes = [2, 4], strides = [1, 1]} : vector<2x8xf32> to vector<2x4xf32>
    %180 = vector.extract_strided_slice %178 {offsets = [0, 4], sizes = [2, 4], strides = [1, 1]} : vector<2x8xf32> to vector<2x4xf32>
    %181 = vector.extract_strided_slice %147 {offsets = [0, 8], sizes = [2, 4], strides = [1, 1]} : vector<2x12xf32> to vector<2x4xf32>
    %182 = vector.extract_strided_slice %170 {offsets = [0, 8], sizes = [2, 4], strides = [1, 1]} : vector<2x12xf32> to vector<2x4xf32>
    %183 = vector.broadcast %7 : vector<1x4xf32> to vector<2x4xf32>
    %184 = arith.addf %182, %183 : vector<2x4xf32>
    %185 = arith.mulf %179, %184 : vector<2x4xf32>
    %186 = arith.addf %181, %185 : vector<2x4xf32>
    %187 = math.tanh %186 : vector<2x4xf32>
    %cst_17 = arith.constant 1.000000e+00 : f32
    %188 = vector.broadcast %cst_17 : f32 to vector<2x4xf32>
    %189 = arith.subf %188, %180 : vector<2x4xf32>
    %190 = arith.mulf %189, %187 : vector<2x4xf32>
    %191 = arith.mulf %180, %146 : vector<2x4xf32>
    %192 = arith.addf %190, %191 : vector<2x4xf32>
    %193 = vector.extract_strided_slice %5 {offsets = [8, 0], sizes = [2, 12], strides = [1, 1]} : vector<16x12xf32> to vector<2x12xf32>
    %194 = vector.extract_strided_slice %192 {offsets = [0, 0], sizes = [2, 1], strides = [1, 1]} : vector<2x4xf32> to vector<2x1xf32>
    %195 = vector.extract_strided_slice %6 {offsets = [0, 0], sizes = [1, 12], strides = [1, 1]} : vector<4x12xf32> to vector<1x12xf32>
    %196 = vector.broadcast %194 : vector<2x1xf32> to vector<2x12xf32>
    %197 = vector.broadcast %195 : vector<1x12xf32> to vector<2x12xf32>
    %198 = arith.mulf %196, %197 : vector<2x12xf32>
    %199 = vector.extract_strided_slice %192 {offsets = [0, 1], sizes = [2, 1], strides = [1, 1]} : vector<2x4xf32> to vector<2x1xf32>
    %200 = vector.extract_strided_slice %6 {offsets = [1, 0], sizes = [1, 12], strides = [1, 1]} : vector<4x12xf32> to vector<1x12xf32>
    %201 = vector.broadcast %199 : vector<2x1xf32> to vector<2x12xf32>
    %202 = vector.broadcast %200 : vector<1x12xf32> to vector<2x12xf32>
    %203 = arith.mulf %201, %202 : vector<2x12xf32>
    %204 = arith.addf %198, %203 : vector<2x12xf32>
    %205 = vector.extract_strided_slice %192 {offsets = [0, 2], sizes = [2, 1], strides = [1, 1]} : vector<2x4xf32> to vector<2x1xf32>
    %206 = vector.extract_strided_slice %6 {offsets = [2, 0], sizes = [1, 12], strides = [1, 1]} : vector<4x12xf32> to vector<1x12xf32>
    %207 = vector.broadcast %205 : vector<2x1xf32> to vector<2x12xf32>
    %208 = vector.broadcast %206 : vector<1x12xf32> to vector<2x12xf32>
    %209 = arith.mulf %207, %208 : vector<2x12xf32>
    %210 = arith.addf %204, %209 : vector<2x12xf32>
    %211 = vector.extract_strided_slice %192 {offsets = [0, 3], sizes = [2, 1], strides = [1, 1]} : vector<2x4xf32> to vector<2x1xf32>
    %212 = vector.extract_strided_slice %6 {offsets = [3, 0], sizes = [1, 12], strides = [1, 1]} : vector<4x12xf32> to vector<1x12xf32>
    %213 = vector.broadcast %211 : vector<2x1xf32> to vector<2x12xf32>
    %214 = vector.broadcast %212 : vector<1x12xf32> to vector<2x12xf32>
    %215 = arith.mulf %213, %214 : vector<2x12xf32>
    %216 = arith.addf %210, %215 : vector<2x12xf32>
    %217 = vector.extract_strided_slice %193 {offsets = [0, 0], sizes = [2, 8], strides = [1, 1]} : vector<2x12xf32> to vector<2x8xf32>
    %218 = vector.extract_strided_slice %216 {offsets = [0, 0], sizes = [2, 8], strides = [1, 1]} : vector<2x12xf32> to vector<2x8xf32>
    %219 = arith.addf %217, %218 : vector<2x8xf32>
    %220 = arith.negf %219 : vector<2x8xf32>
    %221 = math.exp %220 : vector<2x8xf32>
    %cst_18 = arith.constant 1.000000e+00 : f32
    %222 = vector.broadcast %cst_18 : f32 to vector<2x8xf32>
    %223 = arith.addf %222, %221 : vector<2x8xf32>
    %224 = arith.divf %222, %223 : vector<2x8xf32>
    %225 = vector.extract_strided_slice %224 {offsets = [0, 0], sizes = [2, 4], strides = [1, 1]} : vector<2x8xf32> to vector<2x4xf32>
    %226 = vector.extract_strided_slice %224 {offsets = [0, 4], sizes = [2, 4], strides = [1, 1]} : vector<2x8xf32> to vector<2x4xf32>
    %227 = vector.extract_strided_slice %193 {offsets = [0, 8], sizes = [2, 4], strides = [1, 1]} : vector<2x12xf32> to vector<2x4xf32>
    %228 = vector.extract_strided_slice %216 {offsets = [0, 8], sizes = [2, 4], strides = [1, 1]} : vector<2x12xf32> to vector<2x4xf32>
    %229 = vector.broadcast %7 : vector<1x4xf32> to vector<2x4xf32>
    %230 = arith.addf %228, %229 : vector<2x4xf32>
    %231 = arith.mulf %225, %230 : vector<2x4xf32>
    %232 = arith.addf %227, %231 : vector<2x4xf32>
    %233 = math.tanh %232 : vector<2x4xf32>
    %cst_19 = arith.constant 1.000000e+00 : f32
    %234 = vector.broadcast %cst_19 : f32 to vector<2x4xf32>
    %235 = arith.subf %234, %226 : vector<2x4xf32>
    %236 = arith.mulf %235, %233 : vector<2x4xf32>
    %237 = arith.mulf %226, %192 : vector<2x4xf32>
    %238 = arith.addf %236, %237 : vector<2x4xf32>
    %239 = vector.extract_strided_slice %5 {offsets = [10, 0], sizes = [2, 12], strides = [1, 1]} : vector<16x12xf32> to vector<2x12xf32>
    %240 = vector.extract_strided_slice %238 {offsets = [0, 0], sizes = [2, 1], strides = [1, 1]} : vector<2x4xf32> to vector<2x1xf32>
    %241 = vector.extract_strided_slice %6 {offsets = [0, 0], sizes = [1, 12], strides = [1, 1]} : vector<4x12xf32> to vector<1x12xf32>
    %242 = vector.broadcast %240 : vector<2x1xf32> to vector<2x12xf32>
    %243 = vector.broadcast %241 : vector<1x12xf32> to vector<2x12xf32>
    %244 = arith.mulf %242, %243 : vector<2x12xf32>
    %245 = vector.extract_strided_slice %238 {offsets = [0, 1], sizes = [2, 1], strides = [1, 1]} : vector<2x4xf32> to vector<2x1xf32>
    %246 = vector.extract_strided_slice %6 {offsets = [1, 0], sizes = [1, 12], strides = [1, 1]} : vector<4x12xf32> to vector<1x12xf32>
    %247 = vector.broadcast %245 : vector<2x1xf32> to vector<2x12xf32>
    %248 = vector.broadcast %246 : vector<1x12xf32> to vector<2x12xf32>
    %249 = arith.mulf %247, %248 : vector<2x12xf32>
    %250 = arith.addf %244, %249 : vector<2x12xf32>
    %251 = vector.extract_strided_slice %238 {offsets = [0, 2], sizes = [2, 1], strides = [1, 1]} : vector<2x4xf32> to vector<2x1xf32>
    %252 = vector.extract_strided_slice %6 {offsets = [2, 0], sizes = [1, 12], strides = [1, 1]} : vector<4x12xf32> to vector<1x12xf32>
    %253 = vector.broadcast %251 : vector<2x1xf32> to vector<2x12xf32>
    %254 = vector.broadcast %252 : vector<1x12xf32> to vector<2x12xf32>
    %255 = arith.mulf %253, %254 : vector<2x12xf32>
    %256 = arith.addf %250, %255 : vector<2x12xf32>
    %257 = vector.extract_strided_slice %238 {offsets = [0, 3], sizes = [2, 1], strides = [1, 1]} : vector<2x4xf32> to vector<2x1xf32>
    %258 = vector.extract_strided_slice %6 {offsets = [3, 0], sizes = [1, 12], strides = [1, 1]} : vector<4x12xf32> to vector<1x12xf32>
    %259 = vector.broadcast %257 : vector<2x1xf32> to vector<2x12xf32>
    %260 = vector.broadcast %258 : vector<1x12xf32> to vector<2x12xf32>
    %261 = arith.mulf %259, %260 : vector<2x12xf32>
    %262 = arith.addf %256, %261 : vector<2x12xf32>
    %263 = vector.extract_strided_slice %239 {offsets = [0, 0], sizes = [2, 8], strides = [1, 1]} : vector<2x12xf32> to vector<2x8xf32>
    %264 = vector.extract_strided_slice %262 {offsets = [0, 0], sizes = [2, 8], strides = [1, 1]} : vector<2x12xf32> to vector<2x8xf32>
    %265 = arith.addf %263, %264 : vector<2x8xf32>
    %266 = arith.negf %265 : vector<2x8xf32>
    %267 = math.exp %266 : vector<2x8xf32>
    %cst_20 = arith.constant 1.000000e+00 : f32
    %268 = vector.broadcast %cst_20 : f32 to vector<2x8xf32>
    %269 = arith.addf %268, %267 : vector<2x8xf32>
    %270 = arith.divf %268, %269 : vector<2x8xf32>
    %271 = vector.extract_strided_slice %270 {offsets = [0, 0], sizes = [2, 4], strides = [1, 1]} : vector<2x8xf32> to vector<2x4xf32>
    %272 = vector.extract_strided_slice %270 {offsets = [0, 4], sizes = [2, 4], strides = [1, 1]} : vector<2x8xf32> to vector<2x4xf32>
    %273 = vector.extract_strided_slice %239 {offsets = [0, 8], sizes = [2, 4], strides = [1, 1]} : vector<2x12xf32> to vector<2x4xf32>
    %274 = vector.extract_strided_slice %262 {offsets = [0, 8], sizes = [2, 4], strides = [1, 1]} : vector<2x12xf32> to vector<2x4xf32>
    %275 = vector.broadcast %7 : vector<1x4xf32> to vector<2x4xf32>
    %276 = arith.addf %274, %275 : vector<2x4xf32>
    %277 = arith.mulf %271, %276 : vector<2x4xf32>
    %278 = arith.addf %273, %277 : vector<2x4xf32>
    %279 = math.tanh %278 : vector<2x4xf32>
    %cst_21 = arith.constant 1.000000e+00 : f32
    %280 = vector.broadcast %cst_21 : f32 to vector<2x4xf32>
    %281 = arith.subf %280, %272 : vector<2x4xf32>
    %282 = arith.mulf %281, %279 : vector<2x4xf32>
    %283 = arith.mulf %272, %238 : vector<2x4xf32>
    %284 = arith.addf %282, %283 : vector<2x4xf32>
    %285 = vector.extract_strided_slice %5 {offsets = [12, 0], sizes = [2, 12], strides = [1, 1]} : vector<16x12xf32> to vector<2x12xf32>
    %286 = vector.extract_strided_slice %284 {offsets = [0, 0], sizes = [2, 1], strides = [1, 1]} : vector<2x4xf32> to vector<2x1xf32>
    %287 = vector.extract_strided_slice %6 {offsets = [0, 0], sizes = [1, 12], strides = [1, 1]} : vector<4x12xf32> to vector<1x12xf32>
    %288 = vector.broadcast %286 : vector<2x1xf32> to vector<2x12xf32>
    %289 = vector.broadcast %287 : vector<1x12xf32> to vector<2x12xf32>
    %290 = arith.mulf %288, %289 : vector<2x12xf32>
    %291 = vector.extract_strided_slice %284 {offsets = [0, 1], sizes = [2, 1], strides = [1, 1]} : vector<2x4xf32> to vector<2x1xf32>
    %292 = vector.extract_strided_slice %6 {offsets = [1, 0], sizes = [1, 12], strides = [1, 1]} : vector<4x12xf32> to vector<1x12xf32>
    %293 = vector.broadcast %291 : vector<2x1xf32> to vector<2x12xf32>
    %294 = vector.broadcast %292 : vector<1x12xf32> to vector<2x12xf32>
    %295 = arith.mulf %293, %294 : vector<2x12xf32>
    %296 = arith.addf %290, %295 : vector<2x12xf32>
    %297 = vector.extract_strided_slice %284 {offsets = [0, 2], sizes = [2, 1], strides = [1, 1]} : vector<2x4xf32> to vector<2x1xf32>
    %298 = vector.extract_strided_slice %6 {offsets = [2, 0], sizes = [1, 12], strides = [1, 1]} : vector<4x12xf32> to vector<1x12xf32>
    %299 = vector.broadcast %297 : vector<2x1xf32> to vector<2x12xf32>
    %300 = vector.broadcast %298 : vector<1x12xf32> to vector<2x12xf32>
    %301 = arith.mulf %299, %300 : vector<2x12xf32>
    %302 = arith.addf %296, %301 : vector<2x12xf32>
    %303 = vector.extract_strided_slice %284 {offsets = [0, 3], sizes = [2, 1], strides = [1, 1]} : vector<2x4xf32> to vector<2x1xf32>
    %304 = vector.extract_strided_slice %6 {offsets = [3, 0], sizes = [1, 12], strides = [1, 1]} : vector<4x12xf32> to vector<1x12xf32>
    %305 = vector.broadcast %303 : vector<2x1xf32> to vector<2x12xf32>
    %306 = vector.broadcast %304 : vector<1x12xf32> to vector<2x12xf32>
    %307 = arith.mulf %305, %306 : vector<2x12xf32>
    %308 = arith.addf %302, %307 : vector<2x12xf32>
    %309 = vector.extract_strided_slice %285 {offsets = [0, 0], sizes = [2, 8], strides = [1, 1]} : vector<2x12xf32> to vector<2x8xf32>
    %310 = vector.extract_strided_slice %308 {offsets = [0, 0], sizes = [2, 8], strides = [1, 1]} : vector<2x12xf32> to vector<2x8xf32>
    %311 = arith.addf %309, %310 : vector<2x8xf32>
    %312 = arith.negf %311 : vector<2x8xf32>
    %313 = math.exp %312 : vector<2x8xf32>
    %cst_22 = arith.constant 1.000000e+00 : f32
    %314 = vector.broadcast %cst_22 : f32 to vector<2x8xf32>
    %315 = arith.addf %314, %313 : vector<2x8xf32>
    %316 = arith.divf %314, %315 : vector<2x8xf32>
    %317 = vector.extract_strided_slice %316 {offsets = [0, 0], sizes = [2, 4], strides = [1, 1]} : vector<2x8xf32> to vector<2x4xf32>
    %318 = vector.extract_strided_slice %316 {offsets = [0, 4], sizes = [2, 4], strides = [1, 1]} : vector<2x8xf32> to vector<2x4xf32>
    %319 = vector.extract_strided_slice %285 {offsets = [0, 8], sizes = [2, 4], strides = [1, 1]} : vector<2x12xf32> to vector<2x4xf32>
    %320 = vector.extract_strided_slice %308 {offsets = [0, 8], sizes = [2, 4], strides = [1, 1]} : vector<2x12xf32> to vector<2x4xf32>
    %321 = vector.broadcast %7 : vector<1x4xf32> to vector<2x4xf32>
    %322 = arith.addf %320, %321 : vector<2x4xf32>
    %323 = arith.mulf %317, %322 : vector<2x4xf32>
    %324 = arith.addf %319, %323 : vector<2x4xf32>
    %325 = math.tanh %324 : vector<2x4xf32>
    %cst_23 = arith.constant 1.000000e+00 : f32
    %326 = vector.broadcast %cst_23 : f32 to vector<2x4xf32>
    %327 = arith.subf %326, %318 : vector<2x4xf32>
    %328 = arith.mulf %327, %325 : vector<2x4xf32>
    %329 = arith.mulf %318, %284 : vector<2x4xf32>
    %330 = arith.addf %328, %329 : vector<2x4xf32>
    %331 = vector.extract_strided_slice %5 {offsets = [14, 0], sizes = [2, 12], strides = [1, 1]} : vector<16x12xf32> to vector<2x12xf32>
    %332 = vector.extract_strided_slice %330 {offsets = [0, 0], sizes = [2, 1], strides = [1, 1]} : vector<2x4xf32> to vector<2x1xf32>
    %333 = vector.extract_strided_slice %6 {offsets = [0, 0], sizes = [1, 12], strides = [1, 1]} : vector<4x12xf32> to vector<1x12xf32>
    %334 = vector.broadcast %332 : vector<2x1xf32> to vector<2x12xf32>
    %335 = vector.broadcast %333 : vector<1x12xf32> to vector<2x12xf32>
    %336 = arith.mulf %334, %335 : vector<2x12xf32>
    %337 = vector.extract_strided_slice %330 {offsets = [0, 1], sizes = [2, 1], strides = [1, 1]} : vector<2x4xf32> to vector<2x1xf32>
    %338 = vector.extract_strided_slice %6 {offsets = [1, 0], sizes = [1, 12], strides = [1, 1]} : vector<4x12xf32> to vector<1x12xf32>
    %339 = vector.broadcast %337 : vector<2x1xf32> to vector<2x12xf32>
    %340 = vector.broadcast %338 : vector<1x12xf32> to vector<2x12xf32>
    %341 = arith.mulf %339, %340 : vector<2x12xf32>
    %342 = arith.addf %336, %341 : vector<2x12xf32>
    %343 = vector.extract_strided_slice %330 {offsets = [0, 2], sizes = [2, 1], strides = [1, 1]} : vector<2x4xf32> to vector<2x1xf32>
    %344 = vector.extract_strided_slice %6 {offsets = [2, 0], sizes = [1, 12], strides = [1, 1]} : vector<4x12xf32> to vector<1x12xf32>
    %345 = vector.broadcast %343 : vector<2x1xf32> to vector<2x12xf32>
    %346 = vector.broadcast %344 : vector<1x12xf32> to vector<2x12xf32>
    %347 = arith.mulf %345, %346 : vector<2x12xf32>
    %348 = arith.addf %342, %347 : vector<2x12xf32>
    %349 = vector.extract_strided_slice %330 {offsets = [0, 3], sizes = [2, 1], strides = [1, 1]} : vector<2x4xf32> to vector<2x1xf32>
    %350 = vector.extract_strided_slice %6 {offsets = [3, 0], sizes = [1, 12], strides = [1, 1]} : vector<4x12xf32> to vector<1x12xf32>
    %351 = vector.broadcast %349 : vector<2x1xf32> to vector<2x12xf32>
    %352 = vector.broadcast %350 : vector<1x12xf32> to vector<2x12xf32>
    %353 = arith.mulf %351, %352 : vector<2x12xf32>
    %354 = arith.addf %348, %353 : vector<2x12xf32>
    %355 = vector.extract_strided_slice %331 {offsets = [0, 0], sizes = [2, 8], strides = [1, 1]} : vector<2x12xf32> to vector<2x8xf32>
    %356 = vector.extract_strided_slice %354 {offsets = [0, 0], sizes = [2, 8], strides = [1, 1]} : vector<2x12xf32> to vector<2x8xf32>
    %357 = arith.addf %355, %356 : vector<2x8xf32>
    %358 = arith.negf %357 : vector<2x8xf32>
    %359 = math.exp %358 : vector<2x8xf32>
    %cst_24 = arith.constant 1.000000e+00 : f32
    %360 = vector.broadcast %cst_24 : f32 to vector<2x8xf32>
    %361 = arith.addf %360, %359 : vector<2x8xf32>
    %362 = arith.divf %360, %361 : vector<2x8xf32>
    %363 = vector.extract_strided_slice %362 {offsets = [0, 0], sizes = [2, 4], strides = [1, 1]} : vector<2x8xf32> to vector<2x4xf32>
    %364 = vector.extract_strided_slice %362 {offsets = [0, 4], sizes = [2, 4], strides = [1, 1]} : vector<2x8xf32> to vector<2x4xf32>
    %365 = vector.extract_strided_slice %331 {offsets = [0, 8], sizes = [2, 4], strides = [1, 1]} : vector<2x12xf32> to vector<2x4xf32>
    %366 = vector.extract_strided_slice %354 {offsets = [0, 8], sizes = [2, 4], strides = [1, 1]} : vector<2x12xf32> to vector<2x4xf32>
    %367 = vector.broadcast %7 : vector<1x4xf32> to vector<2x4xf32>
    %368 = arith.addf %366, %367 : vector<2x4xf32>
    %369 = arith.mulf %363, %368 : vector<2x4xf32>
    %370 = arith.addf %365, %369 : vector<2x4xf32>
    %371 = math.tanh %370 : vector<2x4xf32>
    %cst_25 = arith.constant 1.000000e+00 : f32
    %372 = vector.broadcast %cst_25 : f32 to vector<2x4xf32>
    %373 = arith.subf %372, %364 : vector<2x4xf32>
    %374 = arith.mulf %373, %371 : vector<2x4xf32>
    %375 = arith.mulf %364, %330 : vector<2x4xf32>
    %376 = arith.addf %374, %375 : vector<2x4xf32>
    %c0_26 = arith.constant 0 : index
    %c0_27 = arith.constant 0 : index
    %377 = vector.load %arg5[%c0_26, %c0_27] : memref<4x4xf32, #tpu.memory_space<vmem>>, vector<4x4xf32>
    %cst_28 = arith.constant dense<0.000000e+00> : vector<2x4xf32>
    %378 = tpu.matmul %376, %377, %cst_28 {dimension_numbers = #tpu.dot_dimension_numbers<[1], [0], [0], [1], [0, 0, 1, 1], [], []>} : vector<2x4xf32>, vector<4x4xf32>, vector<2x4xf32> -> vector<2x4xf32>
    %c0_29 = arith.constant 0 : index
    %c0_30 = arith.constant 0 : index
    %379 = vector.load %arg6[%c0_29, %c0_30] : memref<1x4xf32, #tpu.memory_space<vmem>>, vector<1x4xf32>
    %380 = vector.broadcast %379 : vector<1x4xf32> to vector<2x4xf32>
    %381 = arith.addf %378, %380 : vector<2x4xf32>
    %cst_31 = arith.constant 0.000000e+00 : f32
    %382 = vector.broadcast %cst_31 : f32 to vector<2x4xf32>
    %383 = arith.maximumf %381, %382 : vector<2x4xf32>
    %c0_32 = arith.constant 0 : index
    %c0_33 = arith.constant 0 : index
    %384 = vector.load %arg7[%c0_32, %c0_33] : memref<4x2xf32, #tpu.memory_space<vmem>>, vector<4x2xf32>
    %cst_34 = arith.constant dense<0.000000e+00> : vector<2x2xf32>
    %385 = tpu.matmul %383, %384, %cst_34 {dimension_numbers = #tpu.dot_dimension_numbers<[1], [0], [0], [1], [0, 0, 1, 1], [], []>} : vector<2x4xf32>, vector<4x2xf32>, vector<2x2xf32> -> vector<2x2xf32>
    %c0_35 = arith.constant 0 : index
    %c0_36 = arith.constant 0 : index
    %386 = vector.load %arg8[%c0_35, %c0_36] : memref<1x2xf32, #tpu.memory_space<vmem>>, vector<1x2xf32>
    %387 = vector.broadcast %386 : vector<1x2xf32> to vector<2x2xf32>
    %388 = arith.addf %385, %387 : vector<2x2xf32>
    %cst_37 = arith.constant dense<0xFF800000> : vector<2xf32>
    %389 = vector.multi_reduction <maximumf>, %388, %cst_37 [1] : vector<2x2xf32> to vector<2xf32>
    %390 = vector.shape_cast %389 : vector<2xf32> to vector<2x1xf32>
    %391 = vector.broadcast %390 : vector<2x1xf32> to vector<2x2xf32>
    %392 = arith.subf %388, %391 : vector<2x2xf32>
    %393 = math.exp %392 : vector<2x2xf32>
    %cst_38 = arith.constant dense<0.000000e+00> : vector<2xf32>
    %394 = vector.multi_reduction <add>, %393, %cst_38 [1] : vector<2x2xf32> to vector<2xf32>
    %395 = vector.shape_cast %394 : vector<2xf32> to vector<2x1xf32>
    %396 = vector.broadcast %395 : vector<2x1xf32> to vector<2x2xf32>
    %397 = arith.divf %393, %396 : vector<2x2xf32>
    %c0_39 = arith.constant 0 : index
    %c0_40 = arith.constant 0 : index
    %398 = vector.load %arg9[%c0_39, %c0_40] : memref<2x2xf32, #tpu.memory_space<vmem>>, vector<2x2xf32>
    tpu.vector_store %arg9[%c0_39, %c0_40], %397 {strides = array<i32>} : memref<2x2xf32, #tpu.memory_space<vmem>>, vector<2x2xf32>,
    return
  }
}

</mosaic_0001>

<bundles_post_ra>
// kernel: tpu_custom_call.1
= control target key start
LH: loop header
LB: loop body
LE: loop exit
PB: predicated region body
PF: predicated region fallthrough
CT: control target
= control target key end

     0   :  { %vm50_vm0 = vcmask 1043456   ;;  %s937_s13 = smov 8   ;;  %vm43_vm1 = vcmask 31744   ;;  %s1162_s0 = inlined_call_operand.vmem [shape: f32[16,4], index: 0, kind: input, shape index: {}]   ;;  %s1163_s1 = inlined_call_operand.vmem [shape: f32[4,12], index: 1, kind: input, shape index: {}]   ;;  %s1164_s2 = inlined_call_operand.vmem [shape: f32[4,12], index: 2, kind: input, shape index: {}]   ;;  %s1165_s3 = inlined_call_operand.vmem [shape: f32[1,12], index: 3, kind: input, shape index: {}]   ;;  %s1166_s4 = inlined_call_operand.vmem [shape: f32[1,4], index: 4, kind: input, shape index: {}]   ;;  %s1167_s5 = inlined_call_operand.vmem [shape: f32[4,4], index: 5, kind: input, shape index: {}]   ;;  %s1168_s6 = inlined_call_operand.vmem [shape: f32[1,4], index: 6, kind: input, shape index: {}]   ;;  %s1169_s7 = inlined_call_operand.vmem [shape: f32[4,2], index: 7, kind: input, shape index: {}]   ;;  %s1170_s8 = inlined_call_operand.vmem [shape: f32[1,2], index: 8, kind: input, shape index: {}]   ;;  %s1171_s9 = inlined_call_operand.hbm [shape: f32[2,2], index: 9, kind: output, shape index: {}]  }
   0x1   :  { %v35_v0 = vld [vmem:[%s1163_s1] sm:$0xf]  ;;  %v34_v3 = vld [vmem:[%s1162_s0 + $0x8] sm:$0xff] }
   0x2   :  { %v792_v1 = vld [vmem:[%s1166_s4] ss:$0 sm:$0xff]  ;;  %813 = vmatprep.subr.msk.mxu0 %vm50_vm0, %v35_v0 }
   0x3   :  { %166 = vrot.lane.b32.xlu0 %v792_v1, %s937_s13  ;;  %v33_v2 = vld [vmem:[%s1162_s0] sm:$0xff]  ;;  %814 = vmatpush3.msk.msra.mxu0 %vm50_vm0, %v35_v0 }
   0x4   :  { %815 = vmatprep.mubr.msk.f32.mxu0 %vm43_vm1, %v33_v2 }
   0x5   :  { %14 = vsyncpa [#allocation3], 0  ;;  %816 = vmatmul.mubr.msk.f32.vlgmr.msra.gmra.mxu0 %vm43_vm1, %v34_v3  ;;  %v131_v4 = vlaneseq  ;;  %v129_v8 = vld [vmem:[%s1164_s2] sm:$0xf]  ;;  %s938_s0 = smov 120   ;;  %v939_v38 = vmov 5  }
   0x6   :  { %v787_v24 = vld [vmem:[%s1165_s3] ss:$0 sm:$0xff]  ;;  %839 = vset.pattern.permute.xlu1 %v939_v38  ;;  %v940_v39 = vmov 4   ;;  %s941_s3 = smov 124   ;;  %v942_v46 = vmov 6   ;;  %v943_v47 = vmov 7  }
   0x7   :  { %v132_v5 = vshrl.u32 %v131_v4, 7  ;;  %838 = vset.pattern.permute.xlu0 %v940_v39  ;;  %vm945_vm2 = vmmov 0   ;;  %vm760_vm3 = vcmask 9216  }
   0x9   :  { %v133_v6 = vsub.s32 0, %v132_v5  ;;  %v138_v7 = vsub.s32 1, %v132_v5  ;;  %v144_v11 = vsub.s32 2, %v132_v5  ;;  %v150_v15 = vsub.s32 3, %v132_v5 }
   0xb   :  { %v1017_v9 = vrot.slane %v129_v8, %v133_v6  ;;  %v1019_v10 = vrot.slane %v129_v8, %v138_v7  ;;  %v1023_v14 = vrot.slane %v129_v8, %v144_v11  ;;  %v1026_v18 = vrot.slane %v129_v8, %v150_v15 }
   0xd   :  { %v135_v12 = vmul.f32 0.0, %v1017_v9  ;;  %v140_v13 = vmul.f32 0.0, %v1019_v10  ;;  %v146_v17 = vmul.f32 0.0, %v1023_v14  ;;  %v152_v20 = vmul.f32 0.0, %v1026_v18 }
   0xf   :  { %v141_v16 = vadd.f32 %v140_v13, %v135_v12 }
  0x11   :  { %v147_v19 = vadd.f32 %v146_v17, %v141_v16 }
  0x13   :  { %v153_v21 = vadd.f32 %v152_v20, %v147_v19 }
  0x75   :  { %v1029_v22 = vpop.permute.xlu0 %166 }
  0x76   :  { %v169_v23 = vadd.f32 %v1029_v22, %v153_v21 }
  0x78   :  { %171 = vrot.lane.b32.xlu0 %v169_v23, %s938_s0 }
  0xc5   :  { %v817_v25 = vpop.f32.mrf.mxu0 }
  0xc6   :  { %v1036_v26 = vadd.f32 %v817_v25, %v787_v24 }
  0xc7   :  { %v120_v27 = vpop.f32.mrf.mxu0 }
  0xc8   :  { %v1038_v28 = vadd.f32 %v787_v24, %v120_v27 }
  0xca   :  { %v154_v29 = vadd.f32 %v153_v21, %v1038_v28 }
  0xcc   :  { %v791_v30 = vmul.f32 -1.442695, %v154_v29 }
  0xce   :  { %863 = vpow2.f32 %v791_v30 }
  0xdb   :  { %v864_v31 = vpop.eup %863 }
  0xdc   :  { %v158_v32 = vadd.f32 1.0, %v864_v31 }
  0xde   :  { %865 = vrcp.f32 %v158_v32 }
  0xea   :  { %v172_v33 = vpop.permute.xlu0 %171 }
  0xeb   :  { %v866_v34 = vpop.eup %865 }
  0xec   :  { %v174_v35 = vmul.f32 %v866_v34, %v172_v33  ;;  %v181_v41 = vsub.f32 1.0, %v866_v34  ;;  %v187_v43 = vmul.f32 0.0, %v866_v34 }
  0xee   :  { %176 = vrot.lane.b32.xlu1 %v174_v35, %s937_s13 }
 0x160   :  { %v177_v36 = vpop.permute.xlu1 %176 }
 0x161   :  { %v179_v37 = vadd.f32 %v177_v36, %v1038_v28 }
 0x163   :  { %867 = vtanh.f32 %v179_v37 }
 0x170   :  { %v868_v40 = vpop.eup %867 }
 0x171   :  { %183 = vrot.lane.b32.xlu1 %v868_v40, %s941_s3 }
 0x1e3   :  { %v184_v42 = vpop.permute.xlu1 %183 }
 0x1e4   :  { %v186_v44 = vmul.f32 %v184_v42, %v181_v41 }
 0x1e6   :  { %v188_v45 = vadd.f32 %v187_v43, %v186_v44 }
 0x1e8   :  { %196 = vperm.xlu1 %839, %v188_v45   ;;  %191 = vperm.xlu0 %838, %v188_v45   ;;  %v242_v11 = vrot.slane %v188_v45, 6 }
 0x1ec   :  { %840 = vset.pattern.permute.xlu1 %v942_v46  ;;  %841 = vset.pattern.permute.xlu0 %v943_v47 }
 0x1ed   :  { %202 = vperm.xlu1 %840, %v188_v45   ;;  %208 = vperm.xlu0 %841, %v188_v45  }
 0x1f1   :  { %842 = vset.pattern.permute.xlu1 %v940_v39  ;;  %843 = vset.pattern.permute.xlu0 %v939_v38 }
 0x263   :  { %v197_v48 = vpop.permute.xlu1 %196  ;;  %v192_v49 = vpop.permute.xlu0 %191 }
 0x264   :  { %v199_v50 = vmul.f32 %v197_v48, %v1019_v10  ;;  %v194_v51 = vmul.f32 %v192_v49, %v1017_v9 }
 0x266   :  { %v200_v54 = vadd.f32 %v199_v50, %v194_v51 }
 0x268   :  { %v203_v52 = vpop.permute.xlu1 %202  ;;  %v209_v53 = vpop.permute.xlu0 %208 }
 0x269   :  { %v205_v55 = vmul.f32 %v203_v52, %v1023_v14  ;;  %v211_v57 = vmul.f32 %v209_v53, %v1026_v18 }
 0x26b   :  { %v206_v56 = vadd.f32 %v205_v55, %v200_v54 }
 0x26d   :  { %v212_v58 = vadd.f32 %v211_v57, %v206_v56 }
 0x26f   :  { %v223_v59 = vadd.f32 %v212_v58, %v1029_v22  ;;  %v214_v61 = vrot.slane %v212_v58, 6 }
 0x271   :  { %v225_v60 = vrot.slane %v223_v59, 6  ;;  %v216_v62 = vadd.f32 %v214_v61, %v1038_v28 }
 0x273   :  { %226 = vrot.lane.b32.xlu1 %v225_v60, %s938_s0  ;;  %v793_v63 = vmul.f32 -1.442695, %v216_v62 }
 0x275   :  { %869 = vpow2.f32 %v793_v63 }
 0x282   :  { %v870_v0 = vpop.eup %869 }
 0x283   :  { %v220_v1 = vadd.f32 1.0, %v870_v0 }
 0x285   :  { %871 = vrcp.f32 %v220_v1 }
 0x292   :  { %v872_v2 = vpop.eup %871 }
 0x293   :  { %v236_v8 = vsub.f32 1.0, %v872_v2  ;;  %v244_v15 = vmul.f32 %v872_v2, %v242_v11 }
 0x2e5   :  { %v227_v3 = vpop.permute.xlu1 %226 }
 0x2e6   :  { %v229_v4 = vmul.f32 %v872_v2, %v227_v3 }
 0x2e8   :  { %231 = vrot.lane.b32.xlu1 %v229_v4, %s937_s13 }
 0x35a   :  { %v232_v5 = vpop.permute.xlu1 %231 }
 0x35b   :  { %v234_v6 = vadd.f32 %v232_v5, %v1038_v28 }
 0x35d   :  { %873 = vtanh.f32 %v234_v6 }
 0x36a   :  { %v874_v7 = vpop.eup %873 }
 0x36b   :  { %238 = vrot.lane.b32.xlu0 %v874_v7, %s941_s3 }
 0x3dd   :  { %v239_v12 = vpop.permute.xlu0 %238 }
 0x3de   :  { %v241_v13 = vmul.f32 %v239_v12, %v236_v8 }
 0x3e0   :  { %v245_v16 = vadd.f32 %v244_v15, %v241_v13 }
 0x3e2   :  { %253 = vperm.xlu0 %843, %v245_v16   ;;  %248 = vperm.xlu1 %842, %v245_v16   ;;  %v299_v50 = vrot.slane %v245_v16, 6 }
 0x3e6   :  { %844 = vset.pattern.permute.xlu1 %v942_v46 }
 0x3e7   :  { %259 = vperm.xlu1 %844, %v245_v16  }
 0x3eb   :  { %845 = vset.pattern.permute.xlu1 %v943_v47 }
 0x3ec   :  { %265 = vperm.xlu1 %845, %v245_v16  }
 0x3f0   :  { %846 = vset.pattern.permute.xlu1 %v940_v39 }
 0x45d   :  { %v249_v17 = vpop.permute.xlu1 %248  ;;  %v254_v19 = vpop.permute.xlu0 %253 }
 0x45e   :  { %v256_v20 = vmul.f32 %v254_v19, %v1019_v10  ;;  %v251_v21 = vmul.f32 %v249_v17, %v1017_v9 }
 0x460   :  { %v257_v25 = vadd.f32 %v256_v20, %v251_v21 }
 0x462   :  { %v260_v23 = vpop.permute.xlu1 %259 }
 0x463   :  { %v262_v24 = vmul.f32 %v260_v23, %v1023_v14 }
 0x465   :  { %v263_v29 = vadd.f32 %v262_v24, %v257_v25 }
 0x467   :  { %v266_v27 = vpop.permute.xlu1 %265 }
 0x468   :  { %v268_v30 = vmul.f32 %v266_v27, %v1026_v18 }
 0x46a   :  { %v269_v31 = vadd.f32 %v268_v30, %v263_v29 }
 0x46c   :  { %v280_v32 = vadd.f32 %v269_v31, %v1029_v22  ;;  %v271_v34 = vrot.slane %v269_v31, 6 }
 0x46e   :  { %v282_v33 = vrot.slane %v280_v32, 6  ;;  %v273_v35 = vadd.f32 %v271_v34, %v1038_v28 }
 0x470   :  { %283 = vrot.lane.b32.xlu0 %v282_v33, %s938_s0  ;;  %v794_v36 = vmul.f32 -1.442695, %v273_v35 }
 0x472   :  { %875 = vpow2.f32 %v794_v36 }
 0x47f   :  { %v876_v37 = vpop.eup %875 }
 0x480   :  { %v277_v40 = vadd.f32 1.0, %v876_v37 }
 0x482   :  { %877 = vrcp.f32 %v277_v40 }
 0x48f   :  { %v878_v41 = vpop.eup %877 }
 0x490   :  { %v293_v49 = vsub.f32 1.0, %v878_v41  ;;  %v301_v53 = vmul.f32 %v878_v41, %v299_v50 }
 0x4e2   :  { %v284_v42 = vpop.permute.xlu0 %283 }
 0x4e3   :  { %v286_v43 = vmul.f32 %v878_v41, %v284_v42 }
 0x4e5   :  { %288 = vrot.lane.b32.xlu1 %v286_v43, %s937_s13 }
 0x557   :  { %v289_v44 = vpop.permute.xlu1 %288 }
 0x558   :  { %v291_v45 = vadd.f32 %v289_v44, %v1038_v28 }
 0x55a   :  { %879 = vtanh.f32 %v291_v45 }
 0x567   :  { %v880_v48 = vpop.eup %879 }
 0x568   :  { %295 = vrot.lane.b32.xlu0 %v880_v48, %s941_s3 }
 0x5da   :  { %v296_v51 = vpop.permute.xlu0 %295 }
 0x5db   :  { %v298_v52 = vmul.f32 %v296_v51, %v293_v49 }
 0x5dd   :  { %v302_v54 = vadd.f32 %v301_v53, %v298_v52 }
 0x5df   :  { %310 = vperm.xlu0 %843, %v302_v54   ;;  %305 = vperm.xlu1 %846, %v302_v54   ;;  %v356_v20 = vrot.slane %v302_v54, 6 }
 0x5e3   :  { %848 = vset.pattern.permute.xlu0 %v943_v47  ;;  %847 = vset.pattern.permute.xlu1 %v942_v46 }
 0x5e4   :  { %322 = vperm.xlu0 %848, %v302_v54   ;;  %316 = vperm.xlu1 %847, %v302_v54  }
 0x5e8   :  { %850 = vset.pattern.permute.xlu0 %v939_v38  ;;  %849 = vset.pattern.permute.xlu1 %v940_v39 }
 0x65a   :  { %v311_v55 = vpop.permute.xlu0 %310  ;;  %v306_v56 = vpop.permute.xlu1 %305 }
 0x65b   :  { %v313_v57 = vmul.f32 %v311_v55, %v1019_v10  ;;  %v308_v58 = vmul.f32 %v306_v56, %v1017_v9 }
 0x65d   :  { %v314_v61 = vadd.f32 %v313_v57, %v308_v58 }
 0x65f   :  { %v323_v59 = vpop.permute.xlu0 %322  ;;  %v317_v60 = vpop.permute.xlu1 %316 }
 0x660   :  { %v319_v62 = vmul.f32 %v317_v60, %v1023_v14  ;;  %v325_v63 = vmul.f32 %v323_v59, %v1026_v18 }
 0x662   :  { %v320_v0 = vadd.f32 %v319_v62, %v314_v61 }
 0x664   :  { %v326_v1 = vadd.f32 %v325_v63, %v320_v0 }
 0x666   :  { %v337_v2 = vadd.f32 %v326_v1, %v1029_v22  ;;  %v328_v4 = vrot.slane %v326_v1, 6 }
 0x668   :  { %v339_v3 = vrot.slane %v337_v2, 6  ;;  %v330_v5 = vadd.f32 %v328_v4, %v1038_v28 }
 0x66a   :  { %340 = vrot.lane.b32.xlu1 %v339_v3, %s938_s0  ;;  %v795_v6 = vmul.f32 -1.442695, %v330_v5 }
 0x66c   :  { %881 = vpow2.f32 %v795_v6 }
 0x679   :  { %v882_v7 = vpop.eup %881 }
 0x67a   :  { %v334_v8 = vadd.f32 1.0, %v882_v7 }
 0x67c   :  { %883 = vrcp.f32 %v334_v8 }
 0x689   :  { %v884_v11 = vpop.eup %883 }
 0x68a   :  { %v350_v19 = vsub.f32 1.0, %v884_v11  ;;  %v358_v24 = vmul.f32 %v884_v11, %v356_v20 }
 0x6dc   :  { %v341_v12 = vpop.permute.xlu1 %340 }
 0x6dd   :  { %v343_v13 = vmul.f32 %v884_v11, %v341_v12 }
 0x6df   :  { %345 = vrot.lane.b32.xlu1 %v343_v13, %s937_s13 }
 0x751   :  { %v346_v15 = vpop.permute.xlu1 %345 }
 0x752   :  { %v348_v16 = vadd.f32 %v346_v15, %v1038_v28 }
 0x754   :  { %885 = vtanh.f32 %v348_v16 }
 0x761   :  { %v886_v17 = vpop.eup %885 }
 0x762   :  { %352 = vrot.lane.b32.xlu0 %v886_v17, %s941_s3 }
 0x7d4   :  { %v353_v21 = vpop.permute.xlu0 %352 }
 0x7d5   :  { %v355_v23 = vmul.f32 %v353_v21, %v350_v19 }
 0x7d7   :  { %v359_v25 = vadd.f32 %v358_v24, %v355_v23 }
 0x7d9   :  { %367 = vperm.xlu0 %850, %v359_v25   ;;  %362 = vperm.xlu1 %849, %v359_v25   ;;  %v413_v56 = vrot.slane %v359_v25, 6 }
 0x7dd   :  { %851 = vset.pattern.permute.xlu1 %v942_v46 }
 0x7de   :  { %373 = vperm.xlu1 %851, %v359_v25  }
 0x7e2   :  { %852 = vset.pattern.permute.xlu1 %v943_v47 }
 0x7e3   :  { %379 = vperm.xlu1 %852, %v359_v25  }
 0x7e7   :  { %853 = vset.pattern.permute.xlu1 %v940_v39 }
 0x854   :  { %v363_v28 = vpop.permute.xlu1 %362  ;;  %v368_v27 = vpop.permute.xlu0 %367 }
 0x855   :  { %v370_v29 = vmul.f32 %v368_v27, %v1019_v10  ;;  %v365_v30 = vmul.f32 %v363_v28, %v1017_v9 }
 0x857   :  { %v371_v33 = vadd.f32 %v370_v29, %v365_v30 }
 0x859   :  { %v374_v31 = vpop.permute.xlu1 %373 }
 0x85a   :  { %v376_v32 = vmul.f32 %v374_v31, %v1023_v14 }
 0x85c   :  { %v377_v35 = vadd.f32 %v376_v32, %v371_v33 }
 0x85e   :  { %v380_v34 = vpop.permute.xlu1 %379 }
 0x85f   :  { %v382_v36 = vmul.f32 %v380_v34, %v1026_v18 }
 0x861   :  { %v383_v37 = vadd.f32 %v382_v36, %v377_v35 }
 0x863   :  { %v394_v40 = vadd.f32 %v383_v37, %v1029_v22  ;;  %v385_v42 = vrot.slane %v383_v37, 6 }
 0x865   :  { %v396_v41 = vrot.slane %v394_v40, 6  ;;  %v387_v43 = vadd.f32 %v385_v42, %v1036_v26 }
 0x867   :  { %397 = vrot.lane.b32.xlu0 %v396_v41, %s938_s0  ;;  %v796_v44 = vmul.f32 -1.442695, %v387_v43 }
 0x869   :  { %887 = vpow2.f32 %v796_v44 }
 0x876   :  { %v888_v45 = vpop.eup %887 }
 0x877   :  { %v391_v48 = vadd.f32 1.0, %v888_v45 }
 0x879   :  { %889 = vrcp.f32 %v391_v48 }
 0x886   :  { %v890_v49 = vpop.eup %889 }
 0x887   :  { %v407_v55 = vsub.f32 1.0, %v890_v49  ;;  %v415_v59 = vmul.f32 %v890_v49, %v413_v56 }
 0x8d9   :  { %v398_v50 = vpop.permute.xlu0 %397 }
 0x8da   :  { %v400_v51 = vmul.f32 %v890_v49, %v398_v50 }
 0x8dc   :  { %402 = vrot.lane.b32.xlu1 %v400_v51, %s937_s13 }
 0x94e   :  { %v403_v52 = vpop.permute.xlu1 %402 }
 0x94f   :  { %v405_v53 = vadd.f32 %v403_v52, %v1036_v26 }
 0x951   :  { %891 = vtanh.f32 %v405_v53 }
 0x95e   :  { %v892_v54 = vpop.eup %891 }
 0x95f   :  { %409 = vrot.lane.b32.xlu0 %v892_v54, %s941_s3 }
 0x9d1   :  { %v410_v57 = vpop.permute.xlu0 %409 }
 0x9d2   :  { %v412_v58 = vmul.f32 %v410_v57, %v407_v55 }
 0x9d4   :  { %v416_v60 = vadd.f32 %v415_v59, %v412_v58 }
 0x9d6   :  { %424 = vperm.xlu0 %850, %v416_v60   ;;  %419 = vperm.xlu1 %853, %v416_v60   ;;  %v470_v28 = vrot.slane %v416_v60, 6 }
 0x9da   :  { %855 = vset.pattern.permute.xlu0 %v943_v47  ;;  %854 = vset.pattern.permute.xlu1 %v942_v46 }
 0x9db   :  { %436 = vperm.xlu0 %855, %v416_v60   ;;  %430 = vperm.xlu1 %854, %v416_v60  }
 0x9df   :  { %857 = vset.pattern.permute.xlu0 %v939_v38  ;;  %856 = vset.pattern.permute.xlu1 %v940_v39 }
 0xa51   :  { %v425_v61 = vpop.permute.xlu0 %424  ;;  %v420_v62 = vpop.permute.xlu1 %419 }
 0xa52   :  { %v427_v63 = vmul.f32 %v425_v61, %v1019_v10  ;;  %v422_v0 = vmul.f32 %v420_v62, %v1017_v9 }
 0xa54   :  { %v428_v3 = vadd.f32 %v427_v63, %v422_v0 }
 0xa56   :  { %v437_v1 = vpop.permute.xlu0 %436  ;;  %v431_v2 = vpop.permute.xlu1 %430 }
 0xa57   :  { %v433_v4 = vmul.f32 %v431_v2, %v1023_v14  ;;  %v439_v5 = vmul.f32 %v437_v1, %v1026_v18 }
 0xa59   :  { %v434_v6 = vadd.f32 %v433_v4, %v428_v3 }
 0xa5b   :  { %v440_v7 = vadd.f32 %v439_v5, %v434_v6 }
 0xa5d   :  { %v451_v8 = vadd.f32 %v440_v7, %v1029_v22  ;;  %v442_v11 = vrot.slane %v440_v7, 6 }
 0xa5f   :  { %v453_v38 = vrot.slane %v451_v8, 6  ;;  %v444_v12 = vadd.f32 %v442_v11, %v1036_v26 }
 0xa61   :  { %454 = vrot.lane.b32.xlu1 %v453_v38, %s938_s0  ;;  %v797_v13 = vmul.f32 -1.442695, %v444_v12 }
 0xa63   :  { %893 = vpow2.f32 %v797_v13 }
 0xa70   :  { %v894_v15 = vpop.eup %893 }
 0xa71   :  { %v448_v16 = vadd.f32 1.0, %v894_v15 }
 0xa73   :  { %895 = vrcp.f32 %v448_v16 }
 0xa80   :  { %v896_v17 = vpop.eup %895 }
 0xa81   :  { %v464_v25 = vsub.f32 1.0, %v896_v17  ;;  %v472_v30 = vmul.f32 %v896_v17, %v470_v28 }
 0xad3   :  { %v455_v19 = vpop.permute.xlu1 %454 }
 0xad4   :  { %v457_v20 = vmul.f32 %v896_v17, %v455_v19 }
 0xad6   :  { %459 = vrot.lane.b32.xlu1 %v457_v20, %s937_s13 }
 0xb48   :  { %v460_v21 = vpop.permute.xlu1 %459 }
 0xb49   :  { %v462_v23 = vadd.f32 %v460_v21, %v1036_v26  ;;  %v944_v21 = vmov 0.0  }
 0xb4a   :  { %818 = vmatprep.subr.mxu1 %v944_v21  ;;  %820 = vmatprep.mubr.msk.f32.mxu1 %vm945_vm2, %v944_v21 }
 0xb4b   :  { %897 = vtanh.f32 %v462_v23  ;;  %823 = vmatprep.subr.mxu0 %v944_v21  ;;  %825 = vmatprep.mubr.msk.f32.mxu0 %vm945_vm2, %v944_v21 }
 0xb58   :  { %v898_v24 = vpop.eup %897 }
 0xb59   :  { %466 = vrot.lane.b32.xlu0 %v898_v24, %s941_s3 }
 0xbcb   :  { %v467_v27 = vpop.permute.xlu0 %466 }
 0xbcc   :  { %v469_v29 = vmul.f32 %v467_v27, %v464_v25 }
 0xbce   :  { %v473_v31 = vadd.f32 %v472_v30, %v469_v29 }
 0xbd0   :  { %481 = vperm.xlu0 %857, %v473_v31   ;;  %476 = vperm.xlu1 %856, %v473_v31   ;;  %v527_v60 = vrot.slane %v473_v31, 6 }
 0xbd4   :  { %858 = vset.pattern.permute.xlu1 %v942_v46 }
 0xbd5   :  { %487 = vperm.xlu1 %858, %v473_v31  }
 0xbd9   :  { %859 = vset.pattern.permute.xlu1 %v943_v47 }
 0xbda   :  { %493 = vperm.xlu1 %859, %v473_v31  }
 0xbde   :  { %860 = vset.pattern.permute.xlu1 %v940_v39 }
 0xc4b   :  { %v477_v32 = vpop.permute.xlu1 %476  ;;  %v482_v33 = vpop.permute.xlu0 %481 }
 0xc4c   :  { %v484_v34 = vmul.f32 %v482_v33, %v1019_v10  ;;  %v479_v35 = vmul.f32 %v477_v32, %v1017_v9  ;;  %v676_v32 = vld [vmem:[%s1169_s7] sm:$0xf] }
 0xc4d   :  { %824 = vmatpush3.msk.msra.mxu0 %vm50_vm0, %v676_v32  ;;  %v800_v33 = vld [vmem:[%s1168_s6] ss:$0 sm:$0xff]  ;;  %s946_s6 = smov [#allocation2]  }
 0xc4e   :  { %v485_v40 = vadd.f32 %v484_v34, %v479_v35  ;;  %s779_s7 = sshll.u32 %s946_s6, 4  ;;  %s780_s7 = int_to_ptr.vmem [resolvable:$true] %s779_s7 }
 0xc4f   :  { %p920_p1 = scmp.lt.s32.totalorder %s780_s7, %s780_s7 }
 0xc50   :  { %v488_v36 = vpop.permute.xlu1 %487 }
 0xc51   :  { %v490_v37 = vmul.f32 %v488_v36, %v1023_v14 }
 0xc53   :  { %v491_v42 = vadd.f32 %v490_v37, %v485_v40  ;;  %v803_v40 = vld [vmem:[%s1170_s8] ss:$0 sm:$0xff]  ;;  %s915_s8 = scalar_lea.vmem %s780_s7, 32 }
 0xc54   :  { %p916_p0 = scmp.ne.s32.totalorder %s780_s7, %s915_s8  ;;  %p921_p2 = scmp.lt.s32.totalorder %s915_s8, %s915_s8 }
 0xc55   :  { %v494_v41 = vpop.permute.xlu1 %493 }
 0xc56   :  { %v496_v43 = vmul.f32 %v494_v41, %v1026_v18  ;;  %p922_p3 = por %p921_p2, %p920_p1 }
 0xc58   :  { %v497_v44 = vadd.f32 %v496_v43, %v491_v42  ;;  %p923_p4 = pnand %p922_p3, %p916_p0 }
 0xc5a   :  { %v508_v45 = vadd.f32 %v497_v44, %v1029_v22  ;;  %v499_v39 = vrot.slane %v497_v44, 6 }
 0xc5c   :  { %v510_v48 = vrot.slane %v508_v45, 6  ;;  %v501_v49 = vadd.f32 %v499_v39, %v1036_v26 }
 0xc5e   :  { %511 = vrot.lane.b32.xlu0 %v510_v48, %s938_s0  ;;  %v798_v50 = vmul.f32 -1.442695, %v501_v49 }
 0xc60   :  { %899 = vpow2.f32 %v798_v50 }
 0xc6d   :  { %v900_v51 = vpop.eup %899 }
 0xc6e   :  { %v505_v52 = vadd.f32 1.0, %v900_v51 }
 0xc70   :  { %901 = vrcp.f32 %v505_v52 }
 0xc7d   :  { %v902_v53 = vpop.eup %901 }
 0xc7e   :  { %v521_v59 = vsub.f32 1.0, %v902_v53  ;;  %v529_v63 = vmul.f32 %v902_v53, %v527_v60 }
 0xcd0   :  { %v512_v54 = vpop.permute.xlu0 %511 }
 0xcd1   :  { %v514_v55 = vmul.f32 %v902_v53, %v512_v54 }
 0xcd3   :  { %516 = vrot.lane.b32.xlu1 %v514_v55, %s937_s13 }
 0xd45   :  { %v517_v56 = vpop.permute.xlu1 %516 }
 0xd46   :  { %v519_v57 = vadd.f32 %v517_v56, %v1036_v26 }
 0xd48   :  { %903 = vtanh.f32 %v519_v57 }
 0xd55   :  { %v904_v58 = vpop.eup %903 }
 0xd56   :  { %523 = vrot.lane.b32.xlu0 %v904_v58, %s941_s3 }
 0xdc8   :  { %v524_v61 = vpop.permute.xlu0 %523 }
 0xdc9   :  { %v526_v62 = vmul.f32 %v524_v61, %v521_v59 }
 0xdcb   :  { %v530_v0 = vadd.f32 %v529_v63, %v526_v62 }
 0xdcd   :  { %538 = vperm.xlu0 %857, %v530_v0   ;;  %533 = vperm.xlu1 %860, %v530_v0   ;;  %v584_v25 = vrot.slane %v530_v0, 6 }
 0xdd1   :  { %862 = vset.pattern.permute.xlu0 %v943_v47  ;;  %861 = vset.pattern.permute.xlu1 %v942_v46 }
 0xdd2   :  { %550 = vperm.xlu0 %862, %v530_v0   ;;  %544 = vperm.xlu1 %861, %v530_v0  }
 0xe48   :  { %v539_v1 = vpop.permute.xlu0 %538  ;;  %v534_v2 = vpop.permute.xlu1 %533 }
 0xe49   :  { %v541_v3 = vmul.f32 %v539_v1, %v1019_v10  ;;  %v536_v4 = vmul.f32 %v534_v2, %v1017_v9 }
 0xe4b   :  { %v542_v7 = vadd.f32 %v541_v3, %v536_v4 }
 0xe4d   :  { %v551_v5 = vpop.permute.xlu0 %550  ;;  %v545_v6 = vpop.permute.xlu1 %544 }
 0xe4e   :  { %v547_v8 = vmul.f32 %v545_v6, %v1023_v14  ;;  %v553_v38 = vmul.f32 %v551_v5, %v1026_v18 }
 0xe50   :  { %v548_v11 = vadd.f32 %v547_v8, %v542_v7 }
 0xe52   :  { %v554_v12 = vadd.f32 %v553_v38, %v548_v11 }
 0xe54   :  { %v565_v47 = vadd.f32 %v554_v12, %v1029_v22  ;;  %v556_v13 = vrot.slane %v554_v12, 6  ;;  %v588_v22 = vld [vmem:[%s1167_s5] sm:$0xf] }
 0xe55   :  { %819 = vmatpush3.msk.msra.mxu1 %vm50_vm0, %v588_v22 }
 0xe56   :  { %v567_v46 = vrot.slane %v565_v47, 6  ;;  %v558_v15 = vadd.f32 %v556_v13, %v1036_v26 }
 0xe58   :  { %568 = vrot.lane.b32.xlu1 %v567_v46, %s938_s0  ;;  %v799_v10 = vmul.f32 -1.442695, %v558_v15 }
 0xe5a   :  { %905 = vpow2.f32 %v799_v10 }
 0xe67   :  { %v906_v9 = vpop.eup %905 }
 0xe68   :  { %v562_v16 = vadd.f32 1.0, %v906_v9 }
 0xe6a   :  { %907 = vrcp.f32 %v562_v16 }
 0xe77   :  { %v908_v17 = vpop.eup %907 }
 0xe78   :  { %v578_v24 = vsub.f32 1.0, %v908_v17  ;;  %v586_v27 = vmul.f32 %v908_v17, %v584_v25 }
 0xeca   :  { %v569_v19 = vpop.permute.xlu1 %568 }
 0xecb   :  { %v571_v14 = vmul.f32 %v908_v17, %v569_v19 }
 0xecd   :  { %573 = vrot.lane.b32.xlu1 %v571_v14, %s937_s13 }
 0xf3f   :  { %v574_v18 = vpop.permute.xlu1 %573 }
 0xf40   :  { %v576_v20 = vadd.f32 %v574_v18, %v1036_v26 }
 0xf42   :  { %909 = vtanh.f32 %v576_v20 }
 0xf4f   :  { %v910_v23 = vpop.eup %909 }
 0xf50   :  { %580 = vrot.lane.b32.xlu0 %v910_v23, %s941_s3 }
 0xfc2   :  { %v581_v28 = vpop.permute.xlu0 %580 }
 0xfc3   :  { %v583_v26 = vmul.f32 %v581_v28, %v578_v24 }
 0xfc5   :  { %v587_v29 = vadd.f32 %v586_v27, %v583_v26 }
 0xfc7   :  { %v597_v30 = vrot.slane %v587_v29, 6 }
 0xfc9   :  { %598 = vrot.lane.b32.xlu1 %v597_v30, %s941_s3 }
0x103b   :  { %v599_v31 = vpop.permute.xlu1 %598 }
0x103c   :  { %821 = vmatmul.mubr.msk.f32.vlgmr.msra.gmra.mxu1 %vm43_vm1, %v599_v31 }
0x10fc   :  { %v671_v34 = vpop.f32.mrf.mxu1 }
0x10fd   :  { %v672_v35 = vadd.f32 %v800_v33, %v671_v34 }
0x10fe   :  { %v822_v36 = vpop.f32.mrf.mxu1 }
0x10ff   :  { %v675_v37 = vmax.f32 %v672_v35, 0.0 }
0x1101   :  { %826 = vmatmul.mubr.msk.f32.vlgmr.msra.gmra.mxu0 %vm43_vm1, %v675_v37 }
0x11c1   :  { %v756_v41 = vpop.f32.mrf.mxu0 }
0x11c2   :  { %v757_v42 = vadd.f32 %v803_v40, %v756_v41 }
0x11c3   :  { %v827_v43 = vpop.f32.mrf.mxu0 }
0x11c4   :  { %v761_v44 = vsel %vm760_vm3, %v757_v42, -inf }
0x11c5   :  { %762 = vmax.xlane.f32.xlu0 %v761_v44 }
0x124e   :  { %v763_v45 = vpop.xlane.xlu0 %762 }
0x124f   :  { %v764_v48 = vsub.f32 %v757_v42, %v763_v45 }
0x1251   :  { %v765_v39 = vmul.f32 1.442695, %v764_v48 }
0x1253   :  { %911 = vpow2.f32 %v765_v39 }
0x1260   :  { %v912_v49 = vpop.eup %911 }
0x1261   :  { %v767_v50 = vsel %vm760_vm3, %v912_v49, 0.0 }
0x1262   :  { %768 = vadd.xlane.f32.xlu1 %v767_v50 }
0x12eb   :  { %v769_v51 = vpop.xlane.xlu1 %768 }
0x12ec   :  { %913 = vrcp.f32 %v769_v51 }
0x12f9   :  { %v914_v52 = vpop.eup %913 }
0x12fa   :  { %v771_v53 = vmul.f32 %v914_v52, %v912_v49 }
0x12fc   :  { %772 = vst.msk [vmem:[#allocation2] sm:$0x3] %vm760_vm3, %v771_v53 }
0x12fd   :  { %926 = shalt.err (!%p923_p4)
}
0x12fe   :  { %782 = dma.vmem_to_hbm [thread:$0]  %s780_s7, 32, %s1171_s9, [#allocation3]  }
0x12ff   :  { %935 = dma.done.wait [#allocation3], 32  }
0x1300   :  { %936 = vsyncadd [#allocation3], 4294967264 }
0x1301   :  { %786 = vsyncpa [#allocation3], 1 }

</bundles_post_ra>
